<compile_context>
chip_gen: v5e
topology: v5e:2x2
jax: 0.10.0
libtpu: 0.0.40
codegen_flags: <defaults>
</compile_context>

<pallas_src>
import functools

import jax
import jax.numpy as jnp
from jax.experimental import pallas as pl
from jax.experimental.pallas import tpu as pltpu

LANE = 128          # pad every hidden feature dim to one full lane width
NUM_LAYERS = 4


def mlp_kernel(x_ref, w0_ref, w_ref, b_ref, o_ref):
    # x_ref:  (tb, in_feat)          activation tile, natural (unpadded) lanes
    # w0_ref: (in_feat, 128)         layer-0 weight, out-dim zero-padded
    # w_ref:  (3, 128, 128)          layers 1..3, zero-padded slab
    # b_ref:  (4, 1, 128)            all biases, zero-padded slab
    # o_ref:  (tb, num_class)        lane-narrow output tile (masked store)
    x = x_ref[...]
    w0 = w0_ref[...]
    b = b_ref[...]

    # Layer 0: in_feat is tiny (3) -> per-feature outer-product broadcasts on
    # the VPU; avoids a narrow-K MXU matmul and any lane padding of x.
    in_feat = x.shape[1]
    acc = x[:, 0:1] * w0[0:1, :]
    for f in range(1, in_feat):
        acc = acc + x[:, f : f + 1] * w0[f : f + 1, :]
    h = jnp.maximum(acc + b[0], 0.0)                    # (tb, 128)

    # Layers 1..3: 128x128 zero-padded matmuls on the MXU.
    for l in range(1, NUM_LAYERS):
        h = jnp.dot(h, w_ref[l - 1], preferred_element_type=jnp.float32) + b[l]
        if l < NUM_LAYERS - 1:
            h = jnp.maximum(h, 0.0)

    o_ref[...] = h[:, : o_ref.shape[1]].astype(o_ref.dtype)


def pack_params(params):
    """One-time packing: zero-pad weights/biases into lane-aligned slabs.

    Layer 0's weight keeps its natural (in_feat, .) row count so x never has
    to be lane-padded in HBM; layers 1..3 go into one (3, 128, 128) slab and
    all biases into one (4, 1, 128) slab.  Call once and reuse the result.
    """
    in_feat = params[0][0].shape[0]
    num_class = params[-1][0].shape[1]

    w0 = params[0][0].astype(jnp.float32)
    w0_p = jnp.zeros((in_feat, LANE), jnp.float32).at[:, : w0.shape[1]].set(w0)

    w_slab = jnp.zeros((NUM_LAYERS - 1, LANE, LANE), jnp.float32)
    for l in range(1, NUM_LAYERS):
        w = params[l][0].astype(jnp.float32)
        fin, fout = w.shape
        w_slab = w_slab.at[l - 1, :fin, :fout].set(w)

    b_slab = jnp.zeros((NUM_LAYERS, 1, LANE), jnp.float32)
    for l in range(NUM_LAYERS):
        bvec = params[l][1].reshape(-1).astype(jnp.float32)
        b_slab = b_slab.at[l, 0, : bvec.shape[0]].set(bvec)

    return w0_p, w_slab, b_slab, int(num_class), int(in_feat)


def _round_up(n, m):
    return ((n + m - 1) // m) * m


def _choose_tile(batch):
    # f32 sublane multiple of 8; cap at 512 (good on v6e/v7x roofline, keeps
    # v5e's single store slot unsaturated); cap at ~ceil(B/2) so the
    # "parallel" batch axis has >=2 steps for v7x's two TensorCores.
    if batch <= 8:
        return 8
    tb = min(512, _round_up(batch, 8))
    if batch >= 64:
        tb = min(tb, _round_up(pl.cdiv(batch, 2), 8))
    return tb


@functools.partial(jax.jit, static_argnames=("num_class", "use_pallas"))
def _forward(x, w0_p, w_slab, b_slab, *, num_class, use_pallas):
    batch, in_feat = x.shape

    if not use_pallas:
        # Small-batch path: four tiny matmuls fused by XLA (same padded math).
        h = jnp.maximum(x @ w0_p + b_slab[0], 0.0)
        for l in range(1, NUM_LAYERS):
            h = h @ w_slab[l - 1] + b_slab[l]
            if l < NUM_LAYERS - 1:
                h = jnp.maximum(h, 0.0)
        return h[:, :num_class]

    tb = _choose_tile(batch)
    b_pad = _round_up(batch, tb)
    if b_pad != batch:
        x = jnp.pad(x, ((0, b_pad - batch), (0, 0)))
    grid = (b_pad // tb,)

    out = pl.pallas_call(
        mlp_kernel,
        out_shape=jax.ShapeDtypeStruct((b_pad, num_class), jnp.float32),
        grid_spec=pltpu.PrefetchScalarGridSpec(
            num_scalar_prefetch=0,
            grid=grid,
            in_specs=[
                # activation tile streams over the batch grid (narrow lanes)
                pl.BlockSpec((tb, in_feat), lambda i: (i, 0)),
                # weights / biases: constant block index -> fetched once,
                # VMEM-resident across all batch tiles
                pl.BlockSpec((in_feat, LANE), lambda i: (0, 0)),
                pl.BlockSpec((NUM_LAYERS - 1, LANE, LANE), lambda i: (0, 0, 0)),
                pl.BlockSpec((NUM_LAYERS, 1, LANE), lambda i: (0, 0, 0)),
            ],
            out_specs=pl.BlockSpec((tb, num_class), lambda i: (i, 0)),
        ),
        compiler_params=pltpu.CompilerParams(
            dimension_semantics=("parallel",),   # v7x: split tiles across 2 TCs
        ),
    )(x, w0_p, w_slab, b_slab)

    return out[:batch] if b_pad != batch else out


def mlp_forward(x, packed, *, force_pallas=False):
    """x: (B, input_size) f32.  Returns (B, num_class) f32 logits."""
    w0_p, w_slab, b_slab, num_class, _ = packed
    use_pallas = bool(force_pallas or x.shape[0] >= 128)
    return _forward(x.astype(jnp.float32), w0_p, w_slab, b_slab,
                    num_class=num_class, use_pallas=use_pallas)


def init_linear(key, fan_in, fan_out):
    # Mimics PyTorch nn.Linear default init: U(-1/sqrt(fan_in), 1/sqrt(fan_in)).
    kw, kb = jax.random.split(key)
    bound = 1.0 / jnp.sqrt(float(fan_in))
    w = jax.random.uniform(kw, (fan_in, fan_out), jnp.float32, -bound, bound)
    b = jax.random.uniform(kb, (1, fan_out), jnp.float32, -bound, bound)
    return w, b


if __name__ == "__main__":
    input_size = 3
    num_class = 4      # stand-in for len(bank_dataset.credit_ls)

    key = jax.random.PRNGKey(0)
    k1, k2, k3, k4, kx_s, kx_l = jax.random.split(key, 6)
    params = [
        init_linear(k1, input_size, 50),
        init_linear(k2, 50, 40),
        init_linear(k3, 40, 25),
        init_linear(k4, 25, num_class),
    ]

    packed = pack_params(params)   # cached, reused across all forward calls

    def ref_forward(xx):
        h = xx
        for i, (w, b) in enumerate(params):
            h = h @ w + b
            if i < len(params) - 1:
                h = jnp.maximum(h, 0.0)
        return h

    # Small batch, forced through the Pallas kernel (single 8-row tile).
    x_s = jax.random.normal(kx_s, (8, input_size), jnp.float32)
    out_s = jax.block_until_ready(mlp_forward(x_s, packed, force_pallas=True))
    assert out_s.shape == (8, num_class)
    assert jnp.allclose(out_s, ref_forward(x_s), atol=2e-5, rtol=1e-4), (
        float(jnp.max(jnp.abs(out_s - ref_forward(x_s)))))

    # Larger batch: default Pallas path, 2-step "parallel" grid (256-row tiles).
    x_l = jax.random.normal(kx_l, (512, input_size), jnp.float32)
    out_l = jax.block_until_ready(mlp_forward(x_l, packed))
    assert out_l.shape == (512, num_class)
    assert jnp.allclose(out_l, ref_forward(x_l), atol=2e-5, rtol=1e-4), (
        float(jnp.max(jnp.abs(out_l - ref_forward(x_l)))))

    print("KERNEL_OK")
</pallas_src>

<mosaic_0001>
module attributes {stable_mosaic.version = 11 : i64} {
  func.func @mlp_kernel(%arg0: i32, %arg1: memref<8x3xf32, #tpu.memory_space<vmem>>, %arg2: memref<3x128xf32, #tpu.memory_space<vmem>>, %arg3: memref<3x128x128xf32, #tpu.memory_space<vmem>>, %arg4: memref<4x1x128xf32, #tpu.memory_space<vmem>>, %arg5: memref<8x4xf32, #tpu.memory_space<vmem>>) attributes {dimension_semantics = [#tpu.dimension_semantics<parallel>], iteration_bounds = array<i64: 1>, scalar_prefetch = 0 : i64, scratch_operands = 0 : i64, tpu.core_type = #tpu.core_type<tc>, window_params = [{transform_indices = @transform_0, window_bounds = array<i64: 8, 3>}, {pipeline_mode = #tpu.pipeline_mode<synchronous>, transform_indices = @transform_1, window_bounds = array<i64: 3, 128>}, {pipeline_mode = #tpu.pipeline_mode<synchronous>, transform_indices = @transform_2, window_bounds = array<i64: 3, 128, 128>}, {pipeline_mode = #tpu.pipeline_mode<synchronous>, transform_indices = @transform_3, window_bounds = array<i64: 4, 1, 128>}, {transform_indices = @transform_4, window_bounds = array<i64: 8, 4>}]} {
    %c0 = arith.constant 0 : index
    %c0_0 = arith.constant 0 : index
    %0 = vector.load %arg1[%c0, %c0_0] : memref<8x3xf32, #tpu.memory_space<vmem>>, vector<8x3xf32>
    %c0_1 = arith.constant 0 : index
    %c0_2 = arith.constant 0 : index
    %1 = vector.load %arg2[%c0_1, %c0_2] : memref<3x128xf32, #tpu.memory_space<vmem>>, vector<3x128xf32>
    %c0_3 = arith.constant 0 : index
    %c0_4 = arith.constant 0 : index
    %c0_5 = arith.constant 0 : index
    %2 = vector.load %arg4[%c0_3, %c0_4, %c0_5] : memref<4x1x128xf32, #tpu.memory_space<vmem>>, vector<4x1x128xf32>
    %3 = vector.extract_strided_slice %0 {offsets = [0, 0], sizes = [8, 1], strides = [1, 1]} : vector<8x3xf32> to vector<8x1xf32>
    %4 = vector.extract_strided_slice %1 {offsets = [0, 0], sizes = [1, 128], strides = [1, 1]} : vector<3x128xf32> to vector<1x128xf32>
    %5 = vector.broadcast %3 : vector<8x1xf32> to vector<8x128xf32>
    %6 = vector.broadcast %4 : vector<1x128xf32> to vector<8x128xf32>
    %7 = arith.mulf %5, %6 : vector<8x128xf32>
    %8 = vector.extract_strided_slice %0 {offsets = [0, 1], sizes = [8, 1], strides = [1, 1]} : vector<8x3xf32> to vector<8x1xf32>
    %9 = vector.extract_strided_slice %1 {offsets = [1, 0], sizes = [1, 128], strides = [1, 1]} : vector<3x128xf32> to vector<1x128xf32>
    %10 = vector.broadcast %8 : vector<8x1xf32> to vector<8x128xf32>
    %11 = vector.broadcast %9 : vector<1x128xf32> to vector<8x128xf32>
    %12 = arith.mulf %10, %11 : vector<8x128xf32>
    %13 = arith.addf %7, %12 : vector<8x128xf32>
    %14 = vector.extract_strided_slice %0 {offsets = [0, 2], sizes = [8, 1], strides = [1, 1]} : vector<8x3xf32> to vector<8x1xf32>
    %15 = vector.extract_strided_slice %1 {offsets = [2, 0], sizes = [1, 128], strides = [1, 1]} : vector<3x128xf32> to vector<1x128xf32>
    %16 = vector.broadcast %14 : vector<8x1xf32> to vector<8x128xf32>
    %17 = vector.broadcast %15 : vector<1x128xf32> to vector<8x128xf32>
    %18 = arith.mulf %16, %17 : vector<8x128xf32>
    %19 = arith.addf %13, %18 : vector<8x128xf32>
    %20 = vector.extract_strided_slice %2 {offsets = [0, 0, 0], sizes = [1, 1, 128], strides = [1, 1, 1]} : vector<4x1x128xf32> to vector<1x1x128xf32>
    %21 = vector.shape_cast %20 : vector<1x1x128xf32> to vector<1x128xf32>
    %22 = vector.broadcast %21 : vector<1x128xf32> to vector<8x128xf32>
    %23 = arith.addf %19, %22 : vector<8x128xf32>
    %cst = arith.constant 0.000000e+00 : f32
    %24 = vector.broadcast %cst : f32 to vector<8x128xf32>
    %25 = arith.maximumf %23, %24 : vector<8x128xf32>
    %c0_6 = arith.constant 0 : index
    %c0_7 = arith.constant 0 : index
    %c0_8 = arith.constant 0 : index
    %26 = vector.load %arg3[%c0_6, %c0_7, %c0_8] : memref<3x128x128xf32, #tpu.memory_space<vmem>>, vector<1x128x128xf32>
    %27 = vector.shape_cast %26 : vector<1x128x128xf32> to vector<128x128xf32>
    %cst_9 = arith.constant dense<0.000000e+00> : vector<8x128xf32>
    %28 = tpu.matmul %25, %27, %cst_9 {dimension_numbers = #tpu.dot_dimension_numbers<[1], [0], [0], [1], [0, 0, 1, 1], [], []>} : vector<8x128xf32>, vector<128x128xf32>, vector<8x128xf32> -> vector<8x128xf32>
    %29 = vector.extract_strided_slice %2 {offsets = [1, 0, 0], sizes = [1, 1, 128], strides = [1, 1, 1]} : vector<4x1x128xf32> to vector<1x1x128xf32>
    %30 = vector.shape_cast %29 : vector<1x1x128xf32> to vector<1x128xf32>
    %31 = vector.broadcast %30 : vector<1x128xf32> to vector<8x128xf32>
    %32 = arith.addf %28, %31 : vector<8x128xf32>
    %cst_10 = arith.constant 0.000000e+00 : f32
    %33 = vector.broadcast %cst_10 : f32 to vector<8x128xf32>
    %34 = arith.maximumf %32, %33 : vector<8x128xf32>
    %c1 = arith.constant 1 : index
    %c0_11 = arith.constant 0 : index
    %c0_12 = arith.constant 0 : index
    %35 = vector.load %arg3[%c1, %c0_11, %c0_12] : memref<3x128x128xf32, #tpu.memory_space<vmem>>, vector<1x128x128xf32>
    %36 = vector.shape_cast %35 : vector<1x128x128xf32> to vector<128x128xf32>
    %cst_13 = arith.constant dense<0.000000e+00> : vector<8x128xf32>
    %37 = tpu.matmul %34, %36, %cst_13 {dimension_numbers = #tpu.dot_dimension_numbers<[1], [0], [0], [1], [0, 0, 1, 1], [], []>} : vector<8x128xf32>, vector<128x128xf32>, vector<8x128xf32> -> vector<8x128xf32>
    %38 = vector.extract_strided_slice %2 {offsets = [2, 0, 0], sizes = [1, 1, 128], strides = [1, 1, 1]} : vector<4x1x128xf32> to vector<1x1x128xf32>
    %39 = vector.shape_cast %38 : vector<1x1x128xf32> to vector<1x128xf32>
    %40 = vector.broadcast %39 : vector<1x128xf32> to vector<8x128xf32>
    %41 = arith.addf %37, %40 : vector<8x128xf32>
    %cst_14 = arith.constant 0.000000e+00 : f32
    %42 = vector.broadcast %cst_14 : f32 to vector<8x128xf32>
    %43 = arith.maximumf %41, %42 : vector<8x128xf32>
    %c2 = arith.constant 2 : index
    %c0_15 = arith.constant 0 : index
    %c0_16 = arith.constant 0 : index
    %44 = vector.load %arg3[%c2, %c0_15, %c0_16] : memref<3x128x128xf32, #tpu.memory_space<vmem>>, vector<1x128x128xf32>
    %45 = vector.shape_cast %44 : vector<1x128x128xf32> to vector<128x128xf32>
    %cst_17 = arith.constant dense<0.000000e+00> : vector<8x128xf32>
    %46 = tpu.matmul %43, %45, %cst_17 {dimension_numbers = #tpu.dot_dimension_numbers<[1], [0], [0], [1], [0, 0, 1, 1], [], []>} : vector<8x128xf32>, vector<128x128xf32>, vector<8x128xf32> -> vector<8x128xf32>
    %47 = vector.extract_strided_slice %2 {offsets = [3, 0, 0], sizes = [1, 1, 128], strides = [1, 1, 1]} : vector<4x1x128xf32> to vector<1x1x128xf32>
    %48 = vector.shape_cast %47 : vector<1x1x128xf32> to vector<1x128xf32>
    %49 = vector.broadcast %48 : vector<1x128xf32> to vector<8x128xf32>
    %50 = arith.addf %46, %49 : vector<8x128xf32>
    %51 = vector.extract_strided_slice %50 {offsets = [0, 0], sizes = [8, 4], strides = [1, 1]} : vector<8x128xf32> to vector<8x4xf32>
    %c0_18 = arith.constant 0 : index
    %c0_19 = arith.constant 0 : index
    %52 = vector.load %arg5[%c0_18, %c0_19] : memref<8x4xf32, #tpu.memory_space<vmem>>, vector<8x4xf32>
    tpu.vector_store %arg5[%c0_18, %c0_19], %51 {strides = array<i32>} : memref<8x4xf32, #tpu.memory_space<vmem>>, vector<8x4xf32>,
    return
  }
  func.func @transform_0(%arg0: i32) -> (i32, i32) {
    %c0_i32 = arith.constant 0 : i32
    %c0_i32_0 = arith.constant 0 : i32
    return %arg0, %c0_i32 : i32, i32
  }
  func.func @transform_1(%arg0: i32) -> (i32, i32) {
    %c0_i32 = arith.constant 0 : i32
    %c0_i32_0 = arith.constant 0 : i32
    %c0_i32_1 = arith.constant 0 : i32
    return %c0_i32, %c0_i32_0 : i32, i32
  }
  func.func @transform_2(%arg0: i32) -> (i32, i32, i32) {
    %c0_i32 = arith.constant 0 : i32
    %c0_i32_0 = arith.constant 0 : i32
    %c0_i32_1 = arith.constant 0 : i32
    %c0_i32_2 = arith.constant 0 : i32
    return %c0_i32, %c0_i32_0, %c0_i32_1 : i32, i32, i32
  }
  func.func @transform_3(%arg0: i32) -> (i32, i32, i32) {
    %c0_i32 = arith.constant 0 : i32
    %c0_i32_0 = arith.constant 0 : i32
    %c0_i32_1 = arith.constant 0 : i32
    %c0_i32_2 = arith.constant 0 : i32
    return %c0_i32, %c0_i32_0, %c0_i32_1 : i32, i32, i32
  }
  func.func @transform_4(%arg0: i32) -> (i32, i32) {
    %c0_i32 = arith.constant 0 : i32
    %c0_i32_0 = arith.constant 0 : i32
    return %arg0, %c0_i32 : i32, i32
  }
}

</mosaic_0001>

<bundles_post_ra>
// kernel: _forward.1
= control target key start
LH: loop header
LB: loop body
LE: loop exit
PB: predicated region body
PF: predicated region fallthrough
CT: control target
= control target key end

     0   :  { %9 = vsyncpa [#allocation3], 0  ;;  %s233_s18 = smov [#allocation2]   ;;  %s234_s20 = smov 128   ;;  %s288_s0 = inlined_call_operand.vmem [shape: f32[8,3], index: 0, kind: input, shape index: {}]   ;;  %s289_s1 = inlined_call_operand.vmem [shape: f32[3,128], index: 1, kind: input, shape index: {}]   ;;  %s290_s2 = inlined_call_operand.hbm [shape: f32[3,128,128], index: 2, kind: input, shape index: {}]   ;;  %s291_s3 = inlined_call_operand.vmem [shape: f32[4,1,128], index: 3, kind: input, shape index: {}]   ;;  %s292_s4 = inlined_call_operand.vmem [shape: f32[8,4], index: 4, kind: output, shape index: {}]  }
   0x1   :  { %s18_s17 = sshll.u32 %s290_s2, 4  ;;  %s20_s19 = sshll.u32 %s233_s18, 4  ;;  %s19_s17 = int_to_ptr.hbm [resolvable:$true] %s18_s17  ;;  %s21_s19 = int_to_ptr.vmem [resolvable:$true] %s20_s19 }
   0x2   :  { %s235_s21 = smov 8  }
   0x3   :  { %26 = dma.hbm_to_vmem [thread:$0]  %s19_s17, 6144, %s21_s19, [#allocation3], %s234_s20, %s234_s20, %s235_s21  }
   0x4   :  { %231 = dma.done.wait [#allocation3], 6144  }
   0x5   :  { %232 = vsyncadd [#allocation3], 4294961152  ;;  %v236_v0 = vmov 0   ;;  %v237_v1 = vmov 2   ;;  %v33_v2 = vld [vmem:[%s288_s0] sm:$0xff]  ;;  %v80_v3 = vld [vmem:[#allocation2 + $0x78] sm:$0xff] }
   0x6   :  { %199 = vset.pattern.permute.xlu0 %v236_v0  ;;  %201 = vset.pattern.permute.xlu1 %v237_v1  ;;  %v79_v4 = vld [vmem:[#allocation2 + $0x70] sm:$0xff]  ;;  %v78_v5 = vld [vmem:[#allocation2 + $0x68] sm:$0xff]  ;;  %v77_v6 = vld [vmem:[#allocation2 + $0x60] sm:$0xff]  ;;  %v238_v8 = vmov 1   ;;  %vm186_vm0 = vcmask 31744  }
   0x7   :  { %41 = vperm.xlu0 %199, %v33_v2   ;;  %54 = vperm.xlu1 %201, %v33_v2   ;;  %v76_v7 = vld [vmem:[#allocation2 + $0x58] sm:$0xff]  ;;  %v75_v9 = vld [vmem:[#allocation2 + $0x50] sm:$0xff]  ;;  %v74_v10 = vld [vmem:[#allocation2 + $0x48] sm:$0xff] }
   0x8   :  { %84 = vmatpush.msra.mxu0 %v80_v3  ;;  %v73_v11 = vld [vmem:[#allocation2 + $0x40] sm:$0xff]  ;;  %v72_v12 = vld [vmem:[#allocation2 + $0x38] sm:$0xff]  ;;  %v71_v13 = vld [vmem:[#allocation2 + $0x30] sm:$0xff] }
   0x9   :  { %v70_v14 = vld [vmem:[#allocation2 + $0x28] sm:$0xff]  ;;  %v69_v15 = vld [vmem:[#allocation2 + $0x20] sm:$0xff]  ;;  %v68_v16 = vld [vmem:[#allocation2 + $0x18] sm:$0xff] }
   0xa   :  { %85 = vmatpush.msra.mxu0 %v79_v4  ;;  %v67_v17 = vld [vmem:[#allocation2 + $0x10] sm:$0xff]  ;;  %v66_v18 = vld [vmem:[#allocation2 + $0x8] sm:$0xff]  ;;  %v65_v19 = vld [vmem:[#allocation2] sm:$0xff] }
   0xb   :  { %v121_v20 = vld [vmem:[#allocation2 + $0xf8] sm:$0xff]  ;;  %v120_v21 = vld [vmem:[#allocation2 + $0xf0] sm:$0xff]  ;;  %v119_v22 = vld [vmem:[#allocation2 + $0xe8] sm:$0xff] }
   0xc   :  { %86 = vmatpush.msra.mxu0 %v78_v5  ;;  %125 = vmatpush.msra.mxu1 %v121_v20  ;;  %v118_v23 = vld [vmem:[#allocation2 + $0xe0] sm:$0xff]  ;;  %v117_v24 = vld [vmem:[#allocation2 + $0xd8] sm:$0xff]  ;;  %v116_v25 = vld [vmem:[#allocation2 + $0xd0] sm:$0xff] }
   0xd   :  { %v115_v26 = vld [vmem:[#allocation2 + $0xc8] sm:$0xff]  ;;  %v114_v28 = vld [vmem:[#allocation2 + $0xc0] sm:$0xff]  ;;  %v113_v29 = vld [vmem:[#allocation2 + $0xb8] sm:$0xff] }
   0xe   :  { %87 = vmatpush.msra.mxu0 %v77_v6  ;;  %126 = vmatpush.msra.mxu1 %v120_v21  ;;  %v34_v30 = vld [vmem:[%s289_s1] sm:$0x7]  ;;  %v112_v31 = vld [vmem:[#allocation2 + $0xb0] sm:$0xff]  ;;  %v111_v35 = vld [vmem:[#allocation2 + $0xa8] sm:$0xff] }
   0xf   :  { %200 = vset.pattern.permute.xlu0 %v238_v8  ;;  %v44_v32 = vperm.slane %v34_v30, 0  ;;  %v50_v33 = vperm.slane %v34_v30, 1  ;;  %v57_v34 = vperm.slane %v34_v30, 2  ;;  %v110_v37 = vld [vmem:[#allocation2 + $0xa0] sm:$0xff]  ;;  %v109_v42 = vld [vmem:[#allocation2 + $0x98] sm:$0xff]  ;;  %v108_v48 = vld [vmem:[#allocation2 + $0x90] sm:$0xff] }
  0x10   :  { %47 = vperm.xlu0 %200, %v33_v2   ;;  %88 = vmatpush.msra.mxu0 %v76_v7  ;;  %v203_v44 = vld [vmem:[%s291_s3] ss:$0 sm:$0xff]  ;;  %v107_v49 = vld [vmem:[#allocation2 + $0x88] sm:$0xff]  ;;  %v162_v51 = vld [vmem:[#allocation2 + $0x178] sm:$0xff] }
  0x11   :  { %127 = vmatpush.msra.mxu1 %v119_v22  ;;  %v106_v50 = vld [vmem:[#allocation2 + $0x80] sm:$0xff]  ;;  %v161_v52 = vld [vmem:[#allocation2 + $0x170] sm:$0xff]  ;;  %166 = vmatpush.msra.mxu2 %v162_v51  ;;  %v160_v53 = vld [vmem:[#allocation2 + $0x168] sm:$0xff] }
  0x12   :  { %89 = vmatpush.msra.mxu0 %v75_v9  ;;  %v159_v54 = vld [vmem:[#allocation2 + $0x160] sm:$0xff]  ;;  %v158_v55 = vld [vmem:[#allocation2 + $0x158] sm:$0xff]  ;;  %v157_v56 = vld [vmem:[#allocation2 + $0x150] sm:$0xff] }
  0x13   :  { %128 = vmatpush.msra.mxu1 %v118_v23  ;;  %167 = vmatpush.msra.mxu2 %v161_v52  ;;  %v156_v57 = vld [vmem:[#allocation2 + $0x148] sm:$0xff]  ;;  %v155_v58 = vld [vmem:[#allocation2 + $0x140] sm:$0xff]  ;;  %v154_v59 = vld [vmem:[#allocation2 + $0x138] sm:$0xff] }
  0x14   :  { %90 = vmatpush.msra.mxu0 %v74_v10  ;;  %v153_v60 = vld [vmem:[#allocation2 + $0x130] sm:$0xff]  ;;  %v152_v61 = vld [vmem:[#allocation2 + $0x128] sm:$0xff]  ;;  %v151_v62 = vld [vmem:[#allocation2 + $0x120] sm:$0xff] }
  0x15   :  { %129 = vmatpush.msra.mxu1 %v117_v24  ;;  %168 = vmatpush.msra.mxu2 %v160_v53  ;;  %v150_v63 = vld [vmem:[#allocation2 + $0x118] sm:$0xff]  ;;  %v204_v0 = vld [vmem:[%s291_s3 + $0x1] ss:$0 sm:$0xff]  ;;  %v149_v4 = vld [vmem:[#allocation2 + $0x110] sm:$0xff] }
  0x16   :  { %91 = vmatpush.msra.mxu0 %v73_v11  ;;  %v148_v5 = vld [vmem:[#allocation2 + $0x108] sm:$0xff]  ;;  %v147_v6 = vld [vmem:[#allocation2 + $0x100] sm:$0xff] }
  0x17   :  { %130 = vmatpush.msra.mxu1 %v116_v25  ;;  %169 = vmatpush.msra.mxu2 %v159_v54  ;;  %v205_v7 = vld [vmem:[%s291_s3 + $0x2] ss:$0 sm:$0xff]  ;;  %v206_v11 = vld [vmem:[%s291_s3 + $0x3] ss:$0 sm:$0xff] }
  0x18   :  { %202 = vset.pattern.permute.xlu0 %v237_v1  ;;  %92 = vmatpush.msra.mxu0 %v72_v12 }
  0x19   :  { %131 = vmatpush.msra.mxu1 %v115_v26  ;;  %170 = vmatpush.msra.mxu2 %v158_v55 }
  0x1a   :  { %93 = vmatpush.msra.mxu0 %v71_v13 }
  0x1b   :  { %132 = vmatpush.msra.mxu1 %v114_v28  ;;  %171 = vmatpush.msra.mxu2 %v157_v56 }
  0x1c   :  { %94 = vmatpush.msra.mxu0 %v70_v14 }
  0x1d   :  { %133 = vmatpush.msra.mxu1 %v113_v29  ;;  %172 = vmatpush.msra.mxu2 %v156_v57 }
  0x1e   :  { %95 = vmatpush.msra.mxu0 %v69_v15 }
  0x1f   :  { %134 = vmatpush.msra.mxu1 %v112_v31  ;;  %173 = vmatpush.msra.mxu2 %v155_v58 }
  0x20   :  { %96 = vmatpush.msra.mxu0 %v68_v16 }
  0x21   :  { %135 = vmatpush.msra.mxu1 %v111_v35  ;;  %174 = vmatpush.msra.mxu2 %v154_v59 }
  0x22   :  { %97 = vmatpush.msra.mxu0 %v67_v17 }
  0x23   :  { %136 = vmatpush.msra.mxu1 %v110_v37  ;;  %175 = vmatpush.msra.mxu2 %v153_v60 }
  0x24   :  { %98 = vmatpush.msra.mxu0 %v66_v18 }
  0x25   :  { %137 = vmatpush.msra.mxu1 %v109_v42  ;;  %176 = vmatpush.msra.mxu2 %v152_v61 }
  0x26   :  { %99 = vmatpush.msra.mxu0 %v65_v19 }
  0x27   :  { %138 = vmatpush.msra.mxu1 %v108_v48  ;;  %177 = vmatpush.msra.mxu2 %v151_v62 }
  0x29   :  { %139 = vmatpush.msra.mxu1 %v107_v49  ;;  %178 = vmatpush.msra.mxu2 %v150_v63 }
  0x2b   :  { %140 = vmatpush.msra.mxu1 %v106_v50  ;;  %179 = vmatpush.msra.mxu2 %v149_v4 }
  0x2d   :  { %180 = vmatpush.msra.mxu2 %v148_v5 }
  0x2f   :  { %181 = vmatpush.msra.mxu2 %v147_v6 }
  0x79   :  { %v42_v27 = vpop.permute.xlu0 %41  ;;  %v55_v36 = vpop.permute.xlu1 %54 }
  0x7a   :  { %v45_v39 = vmul.f32 %v44_v32, %v42_v27  ;;  %v58_v41 = vmul.f32 %v57_v34, %v55_v36 }
  0x82   :  { %v48_v38 = vpop.permute.xlu0 %47 }
  0x83   :  { %v51_v40 = vmul.f32 %v50_v33, %v48_v38 }
  0x85   :  { %v52_v43 = vadd.f32 %v51_v40, %v45_v39 }
  0x87   :  { %v59_v45 = vadd.f32 %v58_v41, %v52_v43 }
  0x89   :  { %v63_v46 = vadd.f32 %v203_v44, %v59_v45 }
  0x8b   :  { %v64_v47 = vmax.f32 %v63_v46, 0.0 }
  0x8d   :  { %100 = vmatmul.f32.vlgmr.msra.gmra.mxu0 %v64_v47 }
 0x10a   :  { %v101_v1 = vpop.f32.mrf.mxu0 }
 0x10b   :  { %v102_v2 = vadd.f32 %v204_v0, %v101_v1 }
 0x10d   :  { %v104_v3 = vmax.f32 %v102_v2, 0.0 }
 0x10f   :  { %141 = vmatmul.f32.vlgmr.msra.gmra.mxu1 %v104_v3 }
 0x18c   :  { %v142_v8 = vpop.f32.mrf.mxu1 }
 0x18d   :  { %v143_v9 = vadd.f32 %v205_v7, %v142_v8 }
 0x18f   :  { %v145_v10 = vmax.f32 %v143_v9, 0.0 }
 0x191   :  { %182 = vmatmul.f32.vlgmr.msra.gmra.mxu2 %v145_v10 }
 0x214   :  { %v183_v12 = vpop.f32.mrf.mxu2 }
 0x215   :  { %v184_v13 = vadd.f32 %v206_v11, %v183_v12 }
 0x217   :  { %187 = vst.msk [vmem:[%s292_s4] sm:$0xff] %vm186_vm0, %v184_v13 }
 0x218   :  { %192 = vsyncpa [#allocation3], 1 }

</bundles_post_ra>
